<compile_context>
chip_gen: v6e
topology: v6e:2x2x1
jax: 0.10.0
libtpu: 0.0.40
codegen_flags: <defaults>
</compile_context>

<pallas_src>
import jax
import jax.numpy as jnp
from jax.experimental import pallas as pl
from jax.experimental.pallas import tpu as pltpu

LEAKY_SLOPE = 0.01  # PyTorch nn.LeakyReLU default
BN_EPS = 1e-5       # PyTorch BatchNorm1d default

TB_MAX = 2048       # max batch tile (sweepable 2048-4096; cond+out double-buffers stay << VMEM)
SPLIT_THRESHOLD = 256  # above this, force >=2 (even) grid steps so v7x uses both TensorCores


def _lrelu(x):
    return jnp.where(x > 0, x, LEAKY_SLOPE * x)


def film_generator_kernel(
    cond_ref,          # (TB, D_in)            -- streamed per grid step (original input dtype)
    w1_ref, b1_ref,    # (D_in, H0), (1, H0)   -- BN already folded in
    w2_ref, b2_ref,    # (H0, H1),  (1, H1)
    wh_ref, bh_ref,    # (H1, 2*D_out), (1, 2*D_out)  -- fused gamma|beta head
    out_ref,           # (TB, 2*D_out)         -- fused gamma|beta output (lane dense)
):
    # Cast inside the kernel (no-op on the f32 path) so the wrapper never re-streams condition.
    x = cond_ref[...].astype(w1_ref.dtype)

    # Layer 1: Linear (BN folded) -> LeakyReLU -> Dropout(identity)
    h = jnp.dot(x, w1_ref[...], preferred_element_type=jnp.float32) + b1_ref[...]
    h = _lrelu(h).astype(w2_ref.dtype)

    # Layer 2: Linear -> LeakyReLU (output_activation of _hidden_network)
    h = jnp.dot(h, w2_ref[...], preferred_element_type=jnp.float32) + b2_ref[...]
    h = _lrelu(h).astype(wh_ref.dtype)

    # Fused gamma|beta heads: one matmul, one lane-dense store.
    gb = jnp.dot(h, wh_ref[...], preferred_element_type=jnp.float32) + bh_ref[...]
    out_ref[...] = _lrelu(gb).astype(out_ref.dtype)


def _round_up(x, m):
    return ((x + m - 1) // m) * m


def _choose_batch_tile(batch):
    """Pick TB so that (a) padding is always < one tile, (b) the grid has an even
    count >= 2 once the batch is worth splitting (v7x dual-TC), (c) tiles are as
    large as possible (<= TB_MAX) to amortise the ~0.35 us per-step overhead."""
    if batch <= SPLIT_THRESHOLD:
        return max(8, _round_up(batch, 8))          # single tile; splitting buys nothing
    n_tiles = max(2, pl.cdiv(batch, TB_MAX))
    n_tiles += n_tiles % 2                          # even step count -> balanced across 2 TCs
    return max(8, _round_up(pl.cdiv(batch, n_tiles), 8))


def film_generator(condition, params, *, compute_dtype=None, batch_tile=None):
    """condition: (B, input_dim) -> (gamma, beta), each (B, output_dim).

    compute_dtype: None (auto: bf16 for large batches, f32 otherwise), or an explicit dtype.
    In the bf16 path the outputs are bf16 (halves the dominant HBM out-store)."""
    B, d_in = condition.shape
    h0 = params["w1"].shape[1]
    h1 = params["w2"].shape[1]
    d_out = params["wg"].shape[1]

    if compute_dtype is None:
        compute_dtype = jnp.bfloat16 if B > SPLIT_THRESHOLD else jnp.float32
    out_dtype = compute_dtype

    # --- Fold BatchNorm1d (eval mode) into the first Linear (trace-time, on weights only) ---
    #   (x@W1 + b1) * s + t  ==  x @ (W1 * s) + (b1 * s + t)
    inv_std = 1.0 / jnp.sqrt(params["bn_var"] + BN_EPS)
    scale = params["bn_weight"] * inv_std
    shift = params["bn_bias"] - params["bn_mean"] * scale
    w1 = (params["w1"] * scale[None, :]).astype(compute_dtype)
    b1 = ((params["b1"] * scale + shift)[None, :]).astype(jnp.float32)

    w2 = params["w2"].astype(compute_dtype)
    b2 = params["b2"][None, :].astype(jnp.float32)

    # --- Fuse gamma / beta heads into one lane-dense matmul ---
    wh = jnp.concatenate([params["wg"], params["wb"]], axis=1).astype(compute_dtype)   # (H1, 2*D_out)
    bh = jnp.concatenate([params["bg"], params["bb"]])[None, :].astype(jnp.float32)    # (1, 2*D_out)

    # --- Batch tiling (condition stays in its input dtype; cast happens in-kernel) ---
    cond = condition
    tb = batch_tile if batch_tile is not None else _choose_batch_tile(B)
    b_padded = _round_up(B, tb)
    if b_padded != B:
        cond = jnp.pad(cond, ((0, b_padded - B), (0, 0)))
    grid = (b_padded // tb,)

    cond_spec = pl.BlockSpec((tb, d_in), lambda i: (i, 0))
    out_spec = pl.BlockSpec((tb, 2 * d_out), lambda i: (i, 0))

    def resident(shape):
        # Weights/biases: same block for every grid step -> stay VMEM-resident.
        return pl.BlockSpec(shape, lambda i: (0, 0))

    w_itemsize = jnp.dtype(compute_dtype).itemsize
    cond_itemsize = jnp.dtype(cond.dtype).itemsize
    out_itemsize = jnp.dtype(out_dtype).itemsize
    flops = 2 * b_padded * (d_in * h0 + h0 * h1 + h1 * 2 * d_out)
    bytes_accessed = (
        b_padded * d_in * cond_itemsize                           # streamed condition
        + (d_in * h0 + h0 * h1 + h1 * 2 * d_out) * w_itemsize     # weights (VMEM-resident)
        + (h0 + h1 + 2 * d_out) * 4                               # biases (f32)
        + b_padded * 2 * d_out * out_itemsize                     # fused gamma|beta output
    )

    fused = pl.pallas_call(
        film_generator_kernel,
        out_shape=jax.ShapeDtypeStruct((b_padded, 2 * d_out), out_dtype),
        grid=grid,
        in_specs=[
            cond_spec,
            resident((d_in, h0)), resident((1, h0)),
            resident((h0, h1)), resident((1, h1)),
            resident((h1, 2 * d_out)), resident((1, 2 * d_out)),
        ],
        out_specs=out_spec,
        compiler_params=pltpu.CompilerParams(
            dimension_semantics=("parallel",),   # v7x: shard batch tiles across the 2 TCs
        ),
        cost_estimate=pl.CostEstimate(
            flops=flops, transcendentals=0, bytes_accessed=bytes_accessed
        ),
    )(cond, w1, b1, w2, b2, wh, bh)

    gamma = fused[:B, :d_out]
    beta = fused[:B, d_out:]
    return gamma, beta


# ----------------------------- parameter init / reference -----------------------------

def _xavier_uniform(key, fan_in, fan_out):
    bound = jnp.sqrt(6.0 / (fan_in + fan_out))
    # PyTorch Linear weight is (out, in); stored transposed (in, out) for the kernel.
    return jax.random.uniform(key, (fan_in, fan_out), jnp.float32, -bound, bound)


def _linear_bias(key, fan_in, fan_out):
    bound = 1.0 / jnp.sqrt(fan_in)
    return jax.random.uniform(key, (fan_out,), jnp.float32, -bound, bound)


def init_film_generator_params(key, input_dim, hidden_layer_dims, output_dim):
    # FilmGenerator(input_dim, [H0, H1], output_dim):
    #   _hidden_network = NetworkBlock(input_dim, [H0], H1) -> Linear(in,H0)+BN(H0), Linear(H0,H1)
    #   gamma/beta      = NetworkBlock(H1, [], output_dim)  -> Linear(H1,out)
    assert len(hidden_layer_dims) == 2, "example uses two hidden dims"
    h0, h1 = hidden_layer_dims
    keys = jax.random.split(key, 8)
    return {
        "w1": _xavier_uniform(keys[0], input_dim, h0),
        "b1": _linear_bias(keys[1], input_dim, h0),
        "bn_weight": jnp.linspace(0.9, 1.1, h0, dtype=jnp.float32),
        "bn_bias": jnp.linspace(-0.05, 0.05, h0, dtype=jnp.float32),
        "bn_mean": jnp.linspace(-0.1, 0.1, h0, dtype=jnp.float32),
        "bn_var": jnp.linspace(0.8, 1.2, h0, dtype=jnp.float32),
        "w2": _xavier_uniform(keys[2], h0, h1),
        "b2": _linear_bias(keys[3], h0, h1),
        "wg": _xavier_uniform(keys[4], h1, output_dim),
        "bg": _linear_bias(keys[5], h1, output_dim),
        "wb": _xavier_uniform(keys[6], h1, output_dim),
        "bb": _linear_bias(keys[7], h1, output_dim),
    }


def _reference(condition, params):
    """Pure-JAX reference of the same forward (eval-mode BN, dropout=identity)."""
    inv_std = 1.0 / jnp.sqrt(params["bn_var"] + BN_EPS)
    h = condition @ params["w1"] + params["b1"]
    h = (h - params["bn_mean"]) * inv_std * params["bn_weight"] + params["bn_bias"]
    h = _lrelu(h)
    h = _lrelu(h @ params["w2"] + params["b2"])
    gamma = _lrelu(h @ params["wg"] + params["bg"])
    beta = _lrelu(h @ params["wb"] + params["bb"])
    return gamma, beta


if __name__ == "__main__":
    key = jax.random.PRNGKey(0)
    k_cond, k_params = jax.random.split(key)

    batch = 8
    input_dim = 16
    hidden_layer_dims = [32, 32]
    output_dim = 64

    condition = jax.random.normal(k_cond, (batch, input_dim), jnp.float32)
    params = init_film_generator_params(k_params, input_dim, hidden_layer_dims, output_dim)

    # Small batch -> auto path picks f32 (bit-tight vs reference).
    gamma, beta = film_generator(condition, params)
    gamma, beta = jax.block_until_ready((gamma, beta))

    g_ref, b_ref = _reference(condition, params)
    assert gamma.shape == (batch, output_dim) and beta.shape == (batch, output_dim)
    assert jnp.allclose(gamma, g_ref, atol=1e-5, rtol=1e-5)
    assert jnp.allclose(beta, b_ref, atol=1e-5, rtol=1e-5)

    # Exercise the large-batch bf16 / multi-tile path (even grid count, bf16 output) for coverage.
    big_b = 520  # > SPLIT_THRESHOLD and not a multiple of the tile -> padded remainder path
    big_cond = jax.random.normal(k_cond, (big_b, input_dim), jnp.float32)
    g_big, b_big = jax.block_until_ready(film_generator(big_cond, params))
    g_big_ref, b_big_ref = _reference(big_cond, params)
    assert g_big.shape == (big_b, output_dim) and b_big.shape == (big_b, output_dim)
    assert jnp.allclose(g_big.astype(jnp.float32), g_big_ref, atol=5e-2, rtol=5e-2)
    assert jnp.allclose(b_big.astype(jnp.float32), b_big_ref, atol=5e-2, rtol=5e-2)

    print("KERNEL_OK")
</pallas_src>

<mosaic_0001>
module attributes {stable_mosaic.version = 11 : i64} {
  func.func @film_generator_kernel(%arg0: i32, %arg1: memref<8x16xf32, #tpu.memory_space<vmem>>, %arg2: memref<16x32xf32, #tpu.memory_space<vmem>>, %arg3: memref<1x32xf32, #tpu.memory_space<vmem>>, %arg4: memref<32x32xf32, #tpu.memory_space<vmem>>, %arg5: memref<1x32xf32, #tpu.memory_space<vmem>>, %arg6: memref<32x128xf32, #tpu.memory_space<vmem>>, %arg7: memref<1x128xf32, #tpu.memory_space<vmem>>, %arg8: memref<8x128xf32, #tpu.memory_space<vmem>>) attributes {dimension_semantics = [#tpu.dimension_semantics<parallel>], iteration_bounds = array<i64: 1>, scalar_prefetch = 0 : i64, scratch_operands = 0 : i64, tpu.core_type = #tpu.core_type<tc>, window_params = [{transform_indices = @transform_0, window_bounds = array<i64: 8, 16>}, {pipeline_mode = #tpu.pipeline_mode<synchronous>, transform_indices = @transform_1, window_bounds = array<i64: 16, 32>}, {pipeline_mode = #tpu.pipeline_mode<synchronous>, transform_indices = @transform_2, window_bounds = array<i64: 1, 32>}, {pipeline_mode = #tpu.pipeline_mode<synchronous>, transform_indices = @transform_3, window_bounds = array<i64: 32, 32>}, {pipeline_mode = #tpu.pipeline_mode<synchronous>, transform_indices = @transform_4, window_bounds = array<i64: 1, 32>}, {pipeline_mode = #tpu.pipeline_mode<synchronous>, transform_indices = @transform_5, window_bounds = array<i64: 32, 128>}, {pipeline_mode = #tpu.pipeline_mode<synchronous>, transform_indices = @transform_6, window_bounds = array<i64: 1, 128>}, {transform_indices = @transform_7, window_bounds = array<i64: 8, 128>}]} {
    %c0 = arith.constant 0 : index
    %c0_0 = arith.constant 0 : index
    %0 = vector.load %arg1[%c0, %c0_0] : memref<8x16xf32, #tpu.memory_space<vmem>>, vector<8x16xf32>
    %c0_1 = arith.constant 0 : index
    %c0_2 = arith.constant 0 : index
    %1 = vector.load %arg2[%c0_1, %c0_2] : memref<16x32xf32, #tpu.memory_space<vmem>>, vector<16x32xf32>
    %cst = arith.constant dense<0.000000e+00> : vector<8x32xf32>
    %2 = tpu.matmul %0, %1, %cst {dimension_numbers = #tpu.dot_dimension_numbers<[1], [0], [0], [1], [0, 0, 1, 1], [], []>} : vector<8x16xf32>, vector<16x32xf32>, vector<8x32xf32> -> vector<8x32xf32>
    %c0_3 = arith.constant 0 : index
    %c0_4 = arith.constant 0 : index
    %3 = vector.load %arg3[%c0_3, %c0_4] : memref<1x32xf32, #tpu.memory_space<vmem>>, vector<1x32xf32>
    %4 = vector.broadcast %3 : vector<1x32xf32> to vector<8x32xf32>
    %5 = arith.addf %2, %4 : vector<8x32xf32>
    %cst_5 = arith.constant 0.000000e+00 : f32
    %6 = vector.broadcast %cst_5 : f32 to vector<8x32xf32>
    %7 = arith.cmpf ogt, %5, %6 : vector<8x32xf32>
    %cst_6 = arith.constant 0.00999999977 : f32
    %8 = vector.broadcast %cst_6 : f32 to vector<8x32xf32>
    %9 = arith.mulf %8, %5 : vector<8x32xf32>
    %10 = arith.select %7, %5, %9 : vector<8x32xi1>, vector<8x32xf32>
    %c0_7 = arith.constant 0 : index
    %c0_8 = arith.constant 0 : index
    %11 = vector.load %arg4[%c0_7, %c0_8] : memref<32x32xf32, #tpu.memory_space<vmem>>, vector<32x32xf32>
    %cst_9 = arith.constant dense<0.000000e+00> : vector<8x32xf32>
    %12 = tpu.matmul %10, %11, %cst_9 {dimension_numbers = #tpu.dot_dimension_numbers<[1], [0], [0], [1], [0, 0, 1, 1], [], []>} : vector<8x32xf32>, vector<32x32xf32>, vector<8x32xf32> -> vector<8x32xf32>
    %c0_10 = arith.constant 0 : index
    %c0_11 = arith.constant 0 : index
    %13 = vector.load %arg5[%c0_10, %c0_11] : memref<1x32xf32, #tpu.memory_space<vmem>>, vector<1x32xf32>
    %14 = vector.broadcast %13 : vector<1x32xf32> to vector<8x32xf32>
    %15 = arith.addf %12, %14 : vector<8x32xf32>
    %cst_12 = arith.constant 0.000000e+00 : f32
    %16 = vector.broadcast %cst_12 : f32 to vector<8x32xf32>
    %17 = arith.cmpf ogt, %15, %16 : vector<8x32xf32>
    %cst_13 = arith.constant 0.00999999977 : f32
    %18 = vector.broadcast %cst_13 : f32 to vector<8x32xf32>
    %19 = arith.mulf %18, %15 : vector<8x32xf32>
    %20 = arith.select %17, %15, %19 : vector<8x32xi1>, vector<8x32xf32>
    %c0_14 = arith.constant 0 : index
    %c0_15 = arith.constant 0 : index
    %21 = vector.load %arg6[%c0_14, %c0_15] : memref<32x128xf32, #tpu.memory_space<vmem>>, vector<32x128xf32>
    %cst_16 = arith.constant dense<0.000000e+00> : vector<8x128xf32>
    %22 = tpu.matmul %20, %21, %cst_16 {dimension_numbers = #tpu.dot_dimension_numbers<[1], [0], [0], [1], [0, 0, 1, 1], [], []>} : vector<8x32xf32>, vector<32x128xf32>, vector<8x128xf32> -> vector<8x128xf32>
    %c0_17 = arith.constant 0 : index
    %c0_18 = arith.constant 0 : index
    %23 = vector.load %arg7[%c0_17, %c0_18] : memref<1x128xf32, #tpu.memory_space<vmem>>, vector<1x128xf32>
    %24 = vector.broadcast %23 : vector<1x128xf32> to vector<8x128xf32>
    %25 = arith.addf %22, %24 : vector<8x128xf32>
    %cst_19 = arith.constant 0.000000e+00 : f32
    %26 = vector.broadcast %cst_19 : f32 to vector<8x128xf32>
    %27 = arith.cmpf ogt, %25, %26 : vector<8x128xf32>
    %cst_20 = arith.constant 0.00999999977 : f32
    %28 = vector.broadcast %cst_20 : f32 to vector<8x128xf32>
    %29 = arith.mulf %28, %25 : vector<8x128xf32>
    %30 = arith.select %27, %25, %29 : vector<8x128xi1>, vector<8x128xf32>
    %c0_21 = arith.constant 0 : index
    %c0_22 = arith.constant 0 : index
    %31 = vector.load %arg8[%c0_21, %c0_22] : memref<8x128xf32, #tpu.memory_space<vmem>>, vector<8x128xf32>
    tpu.vector_store %arg8[%c0_21, %c0_22], %30 {strides = array<i32>} : memref<8x128xf32, #tpu.memory_space<vmem>>, vector<8x128xf32>,
    return
  }
  func.func @transform_0(%arg0: i32) -> (i32, i32) {
    %c0_i32 = arith.constant 0 : i32
    %c0_i32_0 = arith.constant 0 : i32
    return %arg0, %c0_i32 : i32, i32
  }
  func.func @transform_1(%arg0: i32) -> (i32, i32) {
    %c0_i32 = arith.constant 0 : i32
    %c0_i32_0 = arith.constant 0 : i32
    %c0_i32_1 = arith.constant 0 : i32
    return %c0_i32, %c0_i32_0 : i32, i32
  }
  func.func @transform_2(%arg0: i32) -> (i32, i32) {
    %c0_i32 = arith.constant 0 : i32
    %c0_i32_0 = arith.constant 0 : i32
    %c0_i32_1 = arith.constant 0 : i32
    return %c0_i32, %c0_i32_0 : i32, i32
  }
  func.func @transform_3(%arg0: i32) -> (i32, i32) {
    %c0_i32 = arith.constant 0 : i32
    %c0_i32_0 = arith.constant 0 : i32
    %c0_i32_1 = arith.constant 0 : i32
    return %c0_i32, %c0_i32_0 : i32, i32
  }
  func.func @transform_4(%arg0: i32) -> (i32, i32) {
    %c0_i32 = arith.constant 0 : i32
    %c0_i32_0 = arith.constant 0 : i32
    %c0_i32_1 = arith.constant 0 : i32
    return %c0_i32, %c0_i32_0 : i32, i32
  }
  func.func @transform_5(%arg0: i32) -> (i32, i32) {
    %c0_i32 = arith.constant 0 : i32
    %c0_i32_0 = arith.constant 0 : i32
    %c0_i32_1 = arith.constant 0 : i32
    return %c0_i32, %c0_i32_0 : i32, i32
  }
  func.func @transform_6(%arg0: i32) -> (i32, i32) {
    %c0_i32 = arith.constant 0 : i32
    %c0_i32_0 = arith.constant 0 : i32
    %c0_i32_1 = arith.constant 0 : i32
    return %c0_i32, %c0_i32_0 : i32, i32
  }
  func.func @transform_7(%arg0: i32) -> (i32, i32) {
    %c0_i32 = arith.constant 0 : i32
    %c0_i32_0 = arith.constant 0 : i32
    return %arg0, %c0_i32 : i32, i32
  }
}

</mosaic_0001>

<bundles_post_ra>
// kernel: tpu_custom_call.1
= control target key start
LH: loop header
LB: loop body
LE: loop exit
PB: predicated region body
PF: predicated region fallthrough
CT: control target
= control target key end

     0   :  { %12 = vsyncpa [#allocation3], 0  ;;  %s612_s0 = inlined_call_operand.hbm [shape: f32[8,16], index: 0, kind: input, shape index: {}]   ;;  %s613_s1 = inlined_call_operand.hbm [shape: f32[16,32], index: 1, kind: input, shape index: {}]   ;;  %s614_s2 = inlined_call_operand.vmem [shape: f32[1,32], index: 2, kind: input, shape index: {}]   ;;  %s615_s3 = inlined_call_operand.hbm [shape: f32[32,32], index: 3, kind: input, shape index: {}]   ;;  %s616_s4 = inlined_call_operand.vmem [shape: f32[1,32], index: 4, kind: input, shape index: {}]   ;;  %s617_s5 = inlined_call_operand.hbm [shape: f32[32,128], index: 5, kind: input, shape index: {}]   ;;  %s618_s6 = inlined_call_operand.vmem [shape: f32[1,128], index: 6, kind: input, shape index: {}]   ;;  %s619_s7 = inlined_call_operand.hbm [shape: f32[8,128], index: 7, kind: output, shape index: {}]  }
   0x1   :  { %13 = vsyncpa [#allocation6], 0 }
   0x2   :  { %14 = vsyncpa [#allocation9], 0 }
   0x3   :  { %15 = vsyncpa [#allocation4], 0  ;;  %s525_s24 = smov [#allocation5]  }
   0x4   :  { %s31_s25 = sshll.u32 %s525_s24, 4  ;;  %s32_s25 = int_to_ptr.vmem [resolvable:$true] %s31_s25 }
   0x5   :  { %s425_s26 = scalar_lea.vmem %s32_s25, 256  ;;  %p430_p1 = scmp.lt.s32.totalorder %s32_s25, %s32_s25 }
   0x6   :  { %p426_p0 = scmp.ne.s32.totalorder %s32_s25, %s425_s26  ;;  %p431_p2 = scmp.lt.s32.totalorder %s425_s26, %s425_s26 }
   0x8   :  { %p432_p3 = por %p431_p2, %p430_p1 }
   0xa   :  { %p433_p4 = pnand %p432_p3, %p426_p0 }
   0xc   :  { %436 = shalt.err (!%p433_p4)
}
   0xd   :  { %s526_s27 = smov 128   ;;  %s527_s28 = smov 8  }
   0xe   :  { %37 = dma.hbm_to_vmem [thread:$0]  %s613_s1, 256, %s32_s25, [#allocation6], %s526_s27, %s526_s27, %s527_s28  }
   0xf   :  { %s528_s8 = smov [#allocation2]   ;;  %s529_s10 = smov [#allocation7]  }
  0x10   :  { %s22_s9 = sshll.u32 %s528_s8, 4  ;;  %s45_s11 = sshll.u32 %s529_s10, 4  ;;  %s23_s9 = int_to_ptr.vmem [resolvable:$true] %s22_s9  ;;  %s46_s11 = int_to_ptr.vmem [resolvable:$true] %s45_s11 }
  0x11   :  { %s445_s12 = scalar_lea.vmem %s23_s9, 128  ;;  %p450_p6 = scmp.lt.s32.totalorder %s23_s9, %s23_s9 }
  0x12   :  { %p446_p5 = scmp.ne.s32.totalorder %s23_s9, %s445_s12  ;;  %p451_p7 = scmp.lt.s32.totalorder %s445_s12, %s445_s12 }
  0x14   :  { %p452_p8 = por %p451_p7, %p450_p6 }
  0x16   :  { %p453_p9 = pnand %p452_p8, %p446_p5 }
  0x18   :  { %456 = shalt.err (!%p453_p9)
}
  0x19   :  { %25 = dma.hbm_to_vmem [thread:$0]  %s612_s0, 128, %s23_s9, [#allocation3]  }
  0x1a   :  { %s465_s15 = scalar_lea.vmem %s46_s11, 512  ;;  %p470_p11 = scmp.lt.s32.totalorder %s46_s11, %s46_s11 }
  0x1b   :  { %p466_p10 = scmp.ne.s32.totalorder %s46_s11, %s465_s15  ;;  %p471_p12 = scmp.lt.s32.totalorder %s465_s15, %s465_s15 }
  0x1d   :  { %p472_p13 = por %p471_p12, %p470_p11 }
  0x1f   :  { %p473_p0 = pnand %p472_p13, %p466_p10 }
  0x21   :  { %476 = shalt.err (!%p473_p0)
}
  0x22   :  { %51 = dma.hbm_to_vmem [thread:$0]  %s615_s3, 512, %s46_s11, [#allocation6], %s526_s27, %s526_s27, %s527_s28  }
  0x23   :  { %s530_s17 = smov [#allocation8]  }
  0x24   :  { %s59_s18 = sshll.u32 %s530_s17, 4  ;;  %s60_s18 = int_to_ptr.vmem [resolvable:$true] %s59_s18 }
  0x25   :  { %s485_s19 = scalar_lea.vmem %s60_s18, 512  ;;  %p490_p2 = scmp.lt.s32.totalorder %s60_s18, %s60_s18 }
  0x26   :  { %p486_p1 = scmp.ne.s32.totalorder %s60_s18, %s485_s19  ;;  %p491_p3 = scmp.lt.s32.totalorder %s485_s19, %s485_s19 }
  0x28   :  { %p492_p4 = por %p491_p3, %p490_p2 }
  0x2a   :  { %p493_p5 = pnand %p492_p4, %p486_p1 }
  0x2c   :  { %496 = shalt.err (!%p493_p5)
}
  0x2d   :  { %65 = dma.hbm_to_vmem [thread:$0]  %s617_s5, 512, %s60_s18, [#allocation9], %s526_s27, %s526_s27, %s527_s28  }
  0x2e   :  { %517 = dma.done.wait [#allocation3], 128  }
  0x2f   :  { %518 = vsyncadd [#allocation3], 4294967168 }
  0x30   :  { %519 = dma.done.wait [#allocation6], 768  }
  0x31   :  { %520 = vsyncadd [#allocation6], 4294966528 }
  0x32   :  { %521 = dma.done.wait [#allocation9], 512  }
  0x33   :  { %522 = vsyncadd [#allocation9], 4294966784  ;;  %v531_v0 = vmov 0.0   ;;  %vm532_vm0 = vmmov 0   ;;  %v82_v1 = vld [vmem:[#allocation5 + $0x8] sm:$0xff]  ;;  %v81_v2 = vld [vmem:[#allocation5] sm:$0xff] }
  0x34   :  { %379 = vmatprep.subr.mxu0 %v531_v0  ;;  %383 = vmatprep.mubr.msk.f32.mxu0 %vm532_vm0, %v531_v0  ;;  %v80_v3 = vld [vmem:[#allocation2] sm:$0xff]  ;;  %vm90_vm1 = vcmask 130048   ;;  %v170_v4 = vld [vmem:[#allocation7 + $0x18] sm:$0xff]  ;;  %v169_v5 = vld [vmem:[#allocation7 + $0x10] sm:$0xff]  ;;  %vm178_vm3 = vcmask 261120   ;;  %s533_s24 = smov [#allocation10]  }
  0x35   :  { %386 = vmatprep.subr.mxu1 %v531_v0  ;;  %394 = vmatprep.mubr.msk.f32.mxu1 %vm532_vm0, %v531_v0  ;;  %v168_v6 = vld [vmem:[#allocation7 + $0x8] sm:$0xff]  ;;  %v167_v7 = vld [vmem:[#allocation7] sm:$0xff]  ;;  %v258_v8 = vld [vmem:[#allocation8 + $0x18] sm:$0xff]  ;;  %s349_s25 = sshll.u32 %s533_s24, 4  ;;  %s350_s25 = int_to_ptr.vmem [resolvable:$true] %s349_s25 }
  0x36   :  { %380 = vmatpush3.msra.mxu0 %v82_v1  ;;  %387 = vmatpush3.msra.mxu1 %v170_v4  ;;  %v360_v9 = vld [vmem:[%s614_s2] ss:$0 sm:$0xff]  ;;  %v257_v15 = vld [vmem:[#allocation8 + $0x10] sm:$0xff]  ;;  %v255_v17 = vld [vmem:[#allocation8] sm:$0xff]  ;;  %p502_p7 = scmp.lt.s32.totalorder %s350_s25, %s350_s25 }
  0x37   :  { %381 = vmatprep.subr.mxu0 %v531_v0  ;;  %388 = vmatprep.subr.mxu1 %v531_v0  ;;  %v256_v16 = vld [vmem:[#allocation8 + $0x8] sm:$0xff] }
  0x38   :  { %382 = vmatpush3.msra.mxu0 %v81_v2  ;;  %389 = vmatpush3.msra.mxu1 %v169_v5  ;;  %v362_v18 = vld [vmem:[%s616_s4] ss:$0 sm:$0xff]  ;;  %s497_s4 = scalar_lea.vmem %s350_s25, 128 }
  0x39   :  { %384 = vmatmul.mubr.msk.f32.vlgmr.msra.gmra.mxu0 %vm90_vm1, %v80_v3  ;;  %397 = vmatprep.subr.mxu0 %v531_v0  ;;  %v364_v24 = vld [vmem:[%s618_s6] ss:$0 sm:$0xff]  ;;  %p498_p6 = scmp.ne.s32.totalorder %s350_s25, %s497_s4  ;;  %p503_p8 = scmp.lt.s32.totalorder %s497_s4, %s497_s4 }
  0x3a   :  { %405 = vmatprep.mubr.msk.f32.mxu0 %vm532_vm0, %v531_v0  ;;  %390 = vmatprep.subr.mxu1 %v531_v0 }
  0x3b   :  { %391 = vmatpush3.msra.mxu1 %v168_v6  ;;  %398 = vmatpush3.msra.mxu0 %v258_v8  ;;  %p504_p9 = por %p503_p8, %p502_p7 }
  0x3c   :  { %392 = vmatprep.subr.mxu1 %v531_v0  ;;  %399 = vmatprep.subr.mxu0 %v531_v0 }
  0x3d   :  { %393 = vmatpush3.msra.mxu1 %v167_v7  ;;  %400 = vmatpush3.msra.mxu0 %v257_v15  ;;  %p505_p10 = pnand %p504_p9, %p498_p6 }
  0x3e   :  { %401 = vmatprep.subr.mxu0 %v531_v0 }
  0x3f   :  { %402 = vmatpush3.msra.mxu0 %v256_v16 }
  0x40   :  { %403 = vmatprep.subr.mxu0 %v531_v0 }
  0x41   :  { %404 = vmatpush3.msra.mxu0 %v255_v17 }
  0xf9   :  { %v160_v10 = vpop.f32.mrf.mxu0 }
  0xfa   :  { %v161_v11 = vadd.f32 %v360_v9, %v160_v10 }
  0xfb   :  { %v385_v12 = vpop.f32.mrf.mxu0 }
  0xfc   :  { %vm164_vm2 = vcmp.gt.f32.partialorder %v161_v11, 0.0  ;;  %v165_v13 = vmul.f32 0.01, %v161_v11 }
  0xfe   :  { %v166_v14 = vsel %vm164_vm2, %v161_v11, %v165_v13 }
  0xff   :  { %395 = vmatmul.mubr.msk.f32.vlgmr.msra.gmra.mxu1 %vm178_vm3, %v166_v14 }
 0x1bf   :  { %v248_v19 = vpop.f32.mrf.mxu1 }
 0x1c0   :  { %v249_v20 = vadd.f32 %v362_v18, %v248_v19 }
 0x1c1   :  { %v396_v21 = vpop.f32.mrf.mxu1 }
 0x1c2   :  { %vm252_vm4 = vcmp.gt.f32.partialorder %v249_v20, 0.0  ;;  %v253_v22 = vmul.f32 0.01, %v249_v20 }
 0x1c4   :  { %v254_v23 = vsel %vm252_vm4, %v249_v20, %v253_v22 }
 0x1c5   :  { %406 = vmatmul.mubr.msk.f32.vlgmr.msra.gmra.mxu0 %vm178_vm3, %v254_v23 }
 0x285   :  { %v335_v25 = vpop.f32.mrf.mxu0 }
 0x286   :  { %v336_v26 = vadd.f32 %v364_v24, %v335_v25 }
 0x287   :  { %v407_v27 = vpop.f32.mrf.mxu0 }
 0x288   :  { %v340_v28 = vmul.f32 0.01, %v336_v26  ;;  %vm339_vm5 = vcmp.gt.f32.partialorder %v336_v26, 0.0 }
 0x28a   :  { %v341_v29 = vsel %vm339_vm5, %v336_v26, %v340_v28 }
 0x28b   :  { %342 = vst [vmem:[#allocation10] sm:$0xff] %v341_v29 }
 0x28c   :  { %508 = shalt.err (!%p505_p10)
}
 0x28d   :  { %352 = dma.vmem_to_hbm [thread:$0]  %s350_s25, 128, %s619_s7, [#allocation4]  }
 0x28e   :  { %523 = dma.done.wait [#allocation4], 128  }
 0x28f   :  { %524 = vsyncadd [#allocation4], 4294967168 }
 0x290   :  { %356 = vsyncpa [#allocation3], 1 }
 0x291   :  { %357 = vsyncpa [#allocation6], 1 }
 0x292   :  { %358 = vsyncpa [#allocation9], 1 }
 0x293   :  { %359 = vsyncpa [#allocation4], 1 }

</bundles_post_ra>
